<compile_context>
chip_gen: v7x
topology: tpu7x:2x2x1
jax: 0.10.0
libtpu: 0.0.40
codegen_flags: <defaults>
</compile_context>

<pallas_src>
import numpy as np
import jax
import jax.numpy as jnp
from jax.experimental import pallas as pl
from jax.experimental.pallas import tpu as pltpu


def _round_up(x, m):
    return ((x + m - 1) // m) * m


def _pad2(x, rows, cols, dtype):
    """Zero-pad a 2-D array to (rows, cols) and cast to dtype."""
    r, c = x.shape
    out = jnp.zeros((rows, cols), dtype)
    return out.at[:r, :c].set(x.astype(dtype))


# ---------------- fused kernel: per-dst-type message + aggregation + finalize ----------------
def _fused_rgcn_kernel(src_idx_ref,      # (R_t,) int32 scalar-prefetch (unused in body)
                       a_ref,            # (1, TM, TK)       bf16  A_r tile
                       x_ref,            # (1, TK, IN)       bf16  X_src tile (selected via src_idx)
                       w_ref,            # (1, IN, OUT_PAD)  f32   W_r
                       xdst_ref,         # (TM, IN)          bf16  dst features (self loop)
                       loopw_ref,        # (IN, OUT_PAD)     f32   self-loop weight
                       bias_ref,         # (1, OUT_PAD)      f32
                       o_ref,            # (TM, OUT_PAD)     f32
                       acc_ref):         # (TM, OUT_PAD)     f32 VMEM scratch accumulator
    r = pl.program_id(1)
    s = pl.program_id(2)

    @pl.when((r == 0) & (s == 0))
    def _init():
        acc_ref[...] = jnp.zeros_like(acc_ref)

    # (A @ X) @ W: narrow in_feat flows through the dominant adjacency matmul;
    # bf16 MXU inputs, f32 accumulation.
    z = jnp.dot(a_ref[0], x_ref[0], preferred_element_type=jnp.float32)        # (TM, IN)
    acc_ref[...] += jnp.dot(z, w_ref[0], preferred_element_type=jnp.float32)   # (TM, OUT_PAD)

    @pl.when((r == pl.num_programs(1) - 1) & (s == pl.num_programs(2) - 1))
    def _finalize():
        h = acc_ref[...]
        h = h + jnp.dot(xdst_ref[...].astype(jnp.float32), loopw_ref[...],
                        preferred_element_type=jnp.float32)                    # self loop
        h = h + bias_ref[...]                                                  # bias
        o_ref[...] = jnp.maximum(h, 0.0)                                       # relu


def _fused_rgcn_dst(src_idx, a_all, x_stack, w_all, x_dst, loop_w, bias,
                    *, tm, tk, in_feat, out_pad):
    num_rel, n_dst_pad, s_pad = a_all.shape
    grid = (n_dst_pad // tm, num_rel, s_pad // tk)
    return pl.pallas_call(
        _fused_rgcn_kernel,
        out_shape=jax.ShapeDtypeStruct((n_dst_pad, out_pad), jnp.float32),
        grid_spec=pltpu.PrefetchScalarGridSpec(
            num_scalar_prefetch=1,
            grid=grid,
            in_specs=[
                pl.BlockSpec((1, tm, tk), lambda d, r, s, si: (r, d, s)),            # A_r tile
                pl.BlockSpec((1, tk, in_feat), lambda d, r, s, si: (si[r], s, 0)),   # X_src tile
                pl.BlockSpec((1, in_feat, out_pad), lambda d, r, s, si: (r, 0, 0)),  # W_r
                pl.BlockSpec((tm, in_feat), lambda d, r, s, si: (d, 0)),             # x_dst tile
                pl.BlockSpec((in_feat, out_pad), lambda d, r, s, si: (0, 0)),        # loop weight
                pl.BlockSpec((1, out_pad), lambda d, r, s, si: (0, 0)),              # bias
            ],
            out_specs=pl.BlockSpec((tm, out_pad), lambda d, r, s, si: (d, 0)),
            scratch_shapes=[pltpu.VMEM((tm, out_pad), jnp.float32)],
        ),
        compiler_params=pltpu.CompilerParams(
            dimension_semantics=("parallel", "arbitrary", "arbitrary")),
    )(src_idx, a_all, x_stack, w_all, x_dst, loop_w, bias)


# ---------------- module wrapper ----------------
class RelGraphConvHeteroPallas:
    def __init__(self, in_feat, out_feat, rel_names, num_bases=None, key=None):
        self.in_feat, self.out_feat = in_feat, out_feat
        self.rel_names = rel_names
        self.num_rels = len(rel_names)
        self.num_bases = num_bases if (num_bases is not None
                                       and 0 <= num_bases <= self.num_rels) else self.num_rels
        k_w, k_c, k_l = jax.random.split(key, 3)
        gain = np.sqrt(2.0)  # calculate_gain('relu')

        def xavier(k, shape, fan_in, fan_out):
            bound = gain * np.sqrt(6.0 / (fan_in + fan_out))
            return jax.random.uniform(k, shape, jnp.float32, -bound, bound)

        self.weight = xavier(k_w, (self.num_bases, in_feat, out_feat),
                             in_feat * out_feat, self.num_bases * out_feat)
        self.w_comp = (xavier(k_c, (self.num_rels, self.num_bases),
                              self.num_bases, self.num_rels)
                       if self.num_bases < self.num_rels else None)
        self.h_bias = jnp.zeros((out_feat,), jnp.float32)
        self.loop_weight = xavier(k_l, (in_feat, out_feat), in_feat, out_feat)

    def compose_weights(self):
        """Basis composition: tiny (R,B)x(B,in*out) matmul -> plain jnp, no kernel launch."""
        if self.w_comp is not None:
            wflat = self.weight.reshape(self.num_bases, self.in_feat * self.out_feat)
            return (self.w_comp @ wflat).reshape(self.num_rels, self.in_feat, self.out_feat)
        return self.weight

    def __call__(self, ntypes, canonical_etypes, a_norms, xs):
        in_feat, out_feat = self.in_feat, self.out_feat
        out_pad = _round_up(out_feat, 128)          # lane-dense output stores
        nt_index = {nt: i for i, nt in enumerate(ntypes)}

        # Shared, stacked, zero-padded bf16 source features (one slab per node type).
        max_src = max(int(x.shape[0]) for x in xs)
        tk = min(512, _round_up(max_src, 128))      # v7x-safe; raise on v5e/v6e if desired
        s_pad = _round_up(max_src, tk)
        x_stack = jnp.stack([_pad2(x, s_pad, in_feat, jnp.bfloat16) for x in xs], axis=0)

        W = self.compose_weights()                                   # (R, in, out) f32
        loop_w_pad = _pad2(self.loop_weight, in_feat, out_pad, jnp.float32)
        bias_pad = _pad2(self.h_bias.reshape(1, out_feat), 1, out_pad, jnp.float32)

        outs = []
        for t, nt in enumerate(ntypes):
            n_dst = int(xs[t].shape[0])
            tm = min(256, _round_up(n_dst, 16))
            n_dst_pad = _round_up(n_dst, tm)

            rel_ids = [i for i, (src, et, dst) in enumerate(canonical_etypes) if dst == nt]
            if rel_ids:
                a_all = jnp.stack(
                    [_pad2(a_norms[canonical_etypes[i][1]], n_dst_pad, s_pad, jnp.bfloat16)
                     for i in rel_ids], axis=0)
                w_all = jnp.stack(
                    [_pad2(W[i], in_feat, out_pad, jnp.float32) for i in rel_ids], axis=0)
                src_idx = jnp.array([nt_index[canonical_etypes[i][0]] for i in rel_ids],
                                    jnp.int32)
            else:
                # Destination type with no incoming relation: zero message contribution,
                # finalize still applies self-loop + bias + relu.
                a_all = jnp.zeros((1, n_dst_pad, s_pad), jnp.bfloat16)
                w_all = jnp.zeros((1, in_feat, out_pad), jnp.float32)
                src_idx = jnp.zeros((1,), jnp.int32)

            x_dst = _pad2(xs[t], n_dst_pad, in_feat, jnp.bfloat16)
            out_full = _fused_rgcn_dst(src_idx, a_all, x_stack, w_all, x_dst,
                                       loop_w_pad, bias_pad,
                                       tm=tm, tk=tk, in_feat=in_feat, out_pad=out_pad)
            outs.append(out_full[:n_dst, :out_feat])
        return outs


# ---------------- pure-JAX reference (mirrors the kernel's bf16 input quantization) ----------------
def ref_forward(layer, ntypes, canonical_etypes, a_norms, xs):
    q = lambda v: v.astype(jnp.bfloat16).astype(jnp.float32)   # same quantization as kernel inputs
    W = layer.compose_weights()
    nt_index = {nt: i for i, nt in enumerate(ntypes)}
    xq = [q(x) for x in xs]
    acc = [jnp.zeros((x.shape[0], layer.out_feat), jnp.float32) for x in xs]
    for i, (src, etype, dst) in enumerate(canonical_etypes):
        msg = xq[nt_index[src]] @ W[i]
        acc[nt_index[dst]] = acc[nt_index[dst]] + q(a_norms[etype]) @ msg
    outs = []
    for i in range(len(ntypes)):
        h = acc[i] + xq[i] @ layer.loop_weight + layer.h_bias
        outs.append(jnp.maximum(h, 0.0))
    return outs


if __name__ == "__main__":
    key = jax.random.PRNGKey(0)
    k_graph, k_feat, k_param = jax.random.split(key, 3)

    in_feat, out_feat = 16, 32
    ntypes = ["user", "item"]
    n_nodes = {"user": 16, "item": 8}
    canonical_etypes = [
        ("user", "follows", "user"),
        ("user", "buys", "item"),
        ("item", "bought-by", "user"),
    ]
    rel_names = [e for _, e, _ in canonical_etypes]

    # Deterministic random graph -> row-normalized adjacency per relation
    # (mean aggregation; zero-in-degree rows stay all-zero, matching DGL's mean).
    a_norms = {}
    gk = k_graph
    for src, etype, dst in canonical_etypes:
        gk, sub = jax.random.split(gk)
        adj = (jax.random.uniform(sub, (n_nodes[dst], n_nodes[src])) < 0.3).astype(jnp.float32)
        deg = jnp.sum(adj, axis=1, keepdims=True)
        a_norms[etype] = adj / jnp.maximum(deg, 1.0)

    fk = jax.random.split(k_feat, len(ntypes))
    xs = [jax.random.normal(fk[i], (n_nodes[nt], in_feat), jnp.float32)
          for i, nt in enumerate(ntypes)]

    layer = RelGraphConvHeteroPallas(in_feat, out_feat, rel_names, num_bases=2, key=k_param)

    outs = layer(ntypes, canonical_etypes, a_norms, xs)
    outs = [jax.block_until_ready(o) for o in outs]

    refs = ref_forward(layer, ntypes, canonical_etypes, a_norms, xs)
    for o, r in zip(outs, refs):
        np.testing.assert_allclose(np.asarray(o), np.asarray(r), rtol=1e-4, atol=1e-5)

    print("KERNEL_OK")
</pallas_src>

<mosaic_0001>
module attributes {stable_mosaic.version = 11 : i64} {
  func.func @_fused_rgcn_kernel(%arg0: i32, %arg1: i32, %arg2: i32, %arg3: memref<2xi32, #tpu.memory_space<smem>>, %arg4: memref<1x16x128xbf16, #tpu.memory_space<vmem>>, %arg5: memref<1x128x16xbf16, #tpu.memory_space<vmem>>, %arg6: memref<1x16x128xf32, #tpu.memory_space<vmem>>, %arg7: memref<16x16xbf16, #tpu.memory_space<vmem>>, %arg8: memref<16x128xf32, #tpu.memory_space<vmem>>, %arg9: memref<1x128xf32, #tpu.memory_space<vmem>>, %arg10: memref<16x128xf32, #tpu.memory_space<vmem>>, %arg11: memref<16x128xf32, #tpu.memory_space<vmem>>) attributes {dimension_semantics = [#tpu.dimension_semantics<parallel>, #tpu.dimension_semantics<arbitrary>, #tpu.dimension_semantics<arbitrary>], iteration_bounds = array<i64: 1, 2, 1>, scalar_prefetch = 1 : i64, scratch_operands = 1 : i64, tpu.core_type = #tpu.core_type<tc>, window_params = [{transform_indices = @transform_0, window_bounds = array<i64: 1, 16, 128>}, {transform_indices = @transform_1, window_bounds = array<i64: 1, 128, 16>}, {transform_indices = @transform_2, window_bounds = array<i64: 1, 16, 128>}, {transform_indices = @transform_3, window_bounds = array<i64: 16, 16>}, {pipeline_mode = #tpu.pipeline_mode<synchronous>, transform_indices = @transform_4, window_bounds = array<i64: 16, 128>}, {pipeline_mode = #tpu.pipeline_mode<synchronous>, transform_indices = @transform_5, window_bounds = array<i64: 1, 128>}, {transform_indices = @transform_6, window_bounds = array<i64: 16, 128>}]} {
    %c0_i32 = arith.constant 0 : i32
    %0 = arith.cmpi eq, %arg1, %c0_i32 : i32
    %c0_i32_0 = arith.constant 0 : i32
    %1 = arith.cmpi eq, %arg2, %c0_i32_0 : i32
    %2 = arith.andi %0, %1 : i1
    %3 = arith.extui %2 : i1 to i32
    %c0_i32_1 = arith.constant 0 : i32
    %4 = arith.cmpi ne, %3, %c0_i32_1 : i32
    scf.if %4 {
      %cst_17 = arith.constant 0.000000e+00 : f32
      %21 = vector.broadcast %cst_17 : f32 to vector<16x128xf32>
      %c0_18 = arith.constant 0 : index
      %c0_19 = arith.constant 0 : index
      %22 = vector.load %arg11[%c0_18, %c0_19] : memref<16x128xf32, #tpu.memory_space<vmem>>, vector<16x128xf32>
      tpu.vector_store %arg11[%c0_18, %c0_19], %21 {strides = array<i32>} : memref<16x128xf32, #tpu.memory_space<vmem>>, vector<16x128xf32>,
    } else {
    }
    %c0 = arith.constant 0 : index
    %c0_2 = arith.constant 0 : index
    %c0_3 = arith.constant 0 : index
    %5 = vector.load %arg4[%c0, %c0_2, %c0_3] : memref<1x16x128xbf16, #tpu.memory_space<vmem>>, vector<1x16x128xbf16>
    %6 = vector.shape_cast %5 : vector<1x16x128xbf16> to vector<16x128xbf16>
    %c0_4 = arith.constant 0 : index
    %c0_5 = arith.constant 0 : index
    %c0_6 = arith.constant 0 : index
    %7 = vector.load %arg5[%c0_4, %c0_5, %c0_6] : memref<1x128x16xbf16, #tpu.memory_space<vmem>>, vector<1x128x16xbf16>
    %8 = vector.shape_cast %7 : vector<1x128x16xbf16> to vector<128x16xbf16>
    %cst = arith.constant dense<0.000000e+00> : vector<16x16xf32>
    %9 = tpu.matmul %6, %8, %cst {dimension_numbers = #tpu.dot_dimension_numbers<[1], [0], [0], [1], [0, 0, 1, 1], [], []>} : vector<16x128xbf16>, vector<128x16xbf16>, vector<16x16xf32> -> vector<16x16xf32>
    %c0_7 = arith.constant 0 : index
    %c0_8 = arith.constant 0 : index
    %10 = vector.load %arg11[%c0_7, %c0_8] : memref<16x128xf32, #tpu.memory_space<vmem>>, vector<16x128xf32>
    %c0_9 = arith.constant 0 : index
    %c0_10 = arith.constant 0 : index
    %c0_11 = arith.constant 0 : index
    %11 = vector.load %arg6[%c0_9, %c0_10, %c0_11] : memref<1x16x128xf32, #tpu.memory_space<vmem>>, vector<1x16x128xf32>
    %12 = vector.shape_cast %11 : vector<1x16x128xf32> to vector<16x128xf32>
    %cst_12 = arith.constant dense<0.000000e+00> : vector<16x128xf32>
    %13 = tpu.matmul %9, %12, %cst_12 {dimension_numbers = #tpu.dot_dimension_numbers<[1], [0], [0], [1], [0, 0, 1, 1], [], []>} : vector<16x16xf32>, vector<16x128xf32>, vector<16x128xf32> -> vector<16x128xf32>
    %14 = arith.addf %10, %13 : vector<16x128xf32>
    %c0_13 = arith.constant 0 : index
    %c0_14 = arith.constant 0 : index
    %15 = vector.load %arg11[%c0_13, %c0_14] : memref<16x128xf32, #tpu.memory_space<vmem>>, vector<16x128xf32>
    tpu.vector_store %arg11[%c0_13, %c0_14], %14 {strides = array<i32>} : memref<16x128xf32, #tpu.memory_space<vmem>>, vector<16x128xf32>,
    %c1_i32 = arith.constant 1 : i32
    %16 = arith.cmpi eq, %arg1, %c1_i32 : i32
    %c0_i32_15 = arith.constant 0 : i32
    %17 = arith.cmpi eq, %arg2, %c0_i32_15 : i32
    %18 = arith.andi %16, %17 : i1
    %19 = arith.extui %18 : i1 to i32
    %c0_i32_16 = arith.constant 0 : i32
    %20 = arith.cmpi ne, %19, %c0_i32_16 : i32
    scf.if %20 {
      %c0_17 = arith.constant 0 : index
      %c0_18 = arith.constant 0 : index
      %21 = vector.load %arg11[%c0_17, %c0_18] : memref<16x128xf32, #tpu.memory_space<vmem>>, vector<16x128xf32>
      %c0_19 = arith.constant 0 : index
      %c0_20 = arith.constant 0 : index
      %22 = vector.load %arg7[%c0_19, %c0_20] : memref<16x16xbf16, #tpu.memory_space<vmem>>, vector<16x16xbf16>
      %23 = arith.extf %22 : vector<16x16xbf16> to vector<16x16xf32>
      %c0_21 = arith.constant 0 : index
      %c0_22 = arith.constant 0 : index
      %24 = vector.load %arg8[%c0_21, %c0_22] : memref<16x128xf32, #tpu.memory_space<vmem>>, vector<16x128xf32>
      %cst_23 = arith.constant dense<0.000000e+00> : vector<16x128xf32>
      %25 = tpu.matmul %23, %24, %cst_23 {dimension_numbers = #tpu.dot_dimension_numbers<[1], [0], [0], [1], [0, 0, 1, 1], [], []>} : vector<16x16xf32>, vector<16x128xf32>, vector<16x128xf32> -> vector<16x128xf32>
      %26 = arith.addf %21, %25 : vector<16x128xf32>
      %c0_24 = arith.constant 0 : index
      %c0_25 = arith.constant 0 : index
      %27 = vector.load %arg9[%c0_24, %c0_25] : memref<1x128xf32, #tpu.memory_space<vmem>>, vector<1x128xf32>
      %28 = vector.broadcast %27 : vector<1x128xf32> to vector<16x128xf32>
      %29 = arith.addf %26, %28 : vector<16x128xf32>
      %cst_26 = arith.constant 0.000000e+00 : f32
      %30 = vector.broadcast %cst_26 : f32 to vector<16x128xf32>
      %31 = arith.maximumf %29, %30 : vector<16x128xf32>
      %c0_27 = arith.constant 0 : index
      %c0_28 = arith.constant 0 : index
      %32 = vector.load %arg10[%c0_27, %c0_28] : memref<16x128xf32, #tpu.memory_space<vmem>>, vector<16x128xf32>
      tpu.vector_store %arg10[%c0_27, %c0_28], %31 {strides = array<i32>} : memref<16x128xf32, #tpu.memory_space<vmem>>, vector<16x128xf32>,
    } else {
    }
    return
  }
  func.func @transform_0(%arg0: i32, %arg1: i32, %arg2: i32, %arg3: memref<2xi32, #tpu.memory_space<smem>>) -> (i32, i32, i32) {
    %c0_i32 = arith.constant 0 : i32
    return %arg1, %arg0, %arg2 : i32, i32, i32
  }
  func.func @transform_1(%arg0: i32, %arg1: i32, %arg2: i32, %arg3: memref<2xi32, #tpu.memory_space<smem>>) -> (i32, i32, i32) {
    %0 = arith.index_cast %arg1 : i32 to index
    %1 = memref.load %arg3[%0] : memref<2xi32, #tpu.memory_space<smem>>
    %c0_i32 = arith.constant 0 : i32
    %c0_i32_0 = arith.constant 0 : i32
    return %1, %arg2, %c0_i32 : i32, i32, i32
  }
  func.func @transform_2(%arg0: i32, %arg1: i32, %arg2: i32, %arg3: memref<2xi32, #tpu.memory_space<smem>>) -> (i32, i32, i32) {
    %c0_i32 = arith.constant 0 : i32
    %c0_i32_0 = arith.constant 0 : i32
    %c0_i32_1 = arith.constant 0 : i32
    return %arg1, %c0_i32, %c0_i32_0 : i32, i32, i32
  }
  func.func @transform_3(%arg0: i32, %arg1: i32, %arg2: i32, %arg3: memref<2xi32, #tpu.memory_space<smem>>) -> (i32, i32) {
    %c0_i32 = arith.constant 0 : i32
    %c0_i32_0 = arith.constant 0 : i32
    return %arg0, %c0_i32 : i32, i32
  }
  func.func @transform_4(%arg0: i32, %arg1: i32, %arg2: i32, %arg3: memref<2xi32, #tpu.memory_space<smem>>) -> (i32, i32) {
    %c0_i32 = arith.constant 0 : i32
    %c0_i32_0 = arith.constant 0 : i32
    %c0_i32_1 = arith.constant 0 : i32
    return %c0_i32, %c0_i32_0 : i32, i32
  }
  func.func @transform_5(%arg0: i32, %arg1: i32, %arg2: i32, %arg3: memref<2xi32, #tpu.memory_space<smem>>) -> (i32, i32) {
    %c0_i32 = arith.constant 0 : i32
    %c0_i32_0 = arith.constant 0 : i32
    %c0_i32_1 = arith.constant 0 : i32
    return %c0_i32, %c0_i32_0 : i32, i32
  }
  func.func @transform_6(%arg0: i32, %arg1: i32, %arg2: i32, %arg3: memref<2xi32, #tpu.memory_space<smem>>) -> (i32, i32) {
    %c0_i32 = arith.constant 0 : i32
    %c0_i32_0 = arith.constant 0 : i32
    return %arg0, %c0_i32 : i32, i32
  }
}

</mosaic_0001>

<bundles_post_ra>
// kernel: tpu_custom_call.1
= control target key start
LH: loop header
LB: loop body
LE: loop exit
PB: predicated region body
PF: predicated region fallthrough
CT: control target
= control target key end

     0   :  { %s1186_s0 = inlined_call_operand.vmem [shape: s32[2], index: 0, kind: input, shape index: {}]   ;;  %s1187_s1 = inlined_call_operand.vmem [shape: bf16[2,16,128], index: 1, kind: input, shape index: {}]   ;;  %s1188_s2 = inlined_call_operand.vmem [shape: bf16[2,128,16], index: 2, kind: input, shape index: {}]   ;;  %s1189_s3 = inlined_call_operand.vmem [shape: f32[2,16,128], index: 3, kind: input, shape index: {}]   ;;  %s1190_s4 = inlined_call_operand.vmem [shape: bf16[16,16], index: 4, kind: input, shape index: {}]   ;;  %s1191_s5 = inlined_call_operand.vmem [shape: f32[16,128], index: 5, kind: input, shape index: {}]   ;;  %s1192_s6 = inlined_call_operand.vmem [shape: f32[1,128], index: 6, kind: input, shape index: {}]   ;;  %s1193_s7 = inlined_call_operand.hbm [shape: f32[16,128], index: 7, kind: output, shape index: {}]  }
   0x1   :  { %s12_s26 = sshll.u32 %s1186_s0, 4  ;;  %s13_s26 = int_to_ptr.vmem [resolvable:$true] %s12_s26 }
   0x2   :  { %s967_s27 = scalar_lea.vmem %s13_s26, 16  ;;  %p972_p1 = scmp.lt.s32.totalorder %s13_s26, %s13_s26 }
   0x3   :  { %p968_p0 = scmp.ne.s32.totalorder %s13_s26, %s967_s27  ;;  %p973_p2 = scmp.lt.s32.totalorder %s967_s27, %s967_s27 }
   0x5   :  { %p974_p3 = por %p973_p2, %p972_p1 }
   0x7   :  { %p975_p4 = pnand %p974_p3, %p968_p0 }
   0x9   :  { %978 = shalt.err (!%p975_p4)  }
   0xa   :  { %s1035_s28 = smov [#allocation4]  }
   0xb   :  { %15 = dma.vmem_to_smem %s13_s26, 16, %s1035_s28, [#allocation3] }
   0xc   :  { %1017 = dma.done.wait [#allocation3], 16 }
   0xd   :  { %1018 = vsyncadd [#allocation3], 4294967280 }
   0xe   :  { %17 = sfence }
   0xf   :  { %18 = vsyncpa [#allocation6], 0  ;;  %s1085_s29 = smov 0   ;;  %s1087_s30 = smov 0  }
  0x10   :  { %s1089_s8 = smov 0  }
  0x11 LB: > { %s822_s0 = sadd.s32 4294967295, %s1033_s8   ;;  %s39_s9 = sadd.s32 1, %s1029_s30  ;;  %s1033_s8 = sphi %s1089_s8, %s24_s8   ;;  %s1029_s30 = sphi %s1087_s30, %s1196_s30   ;;  %s1025_s29 = sphi %s1085_s29, %s1195_s29  }
  0x12   : > { %p41_p5 = scmp.ge.s32.totalorder %s39_s9, 2  ;;  %p826_p6 = scmp.ge.s32.totalorder %s1033_s8, 1 }
  0x13   : > { %p293_p7 = scmp.lt.s32.totalorder %s1033_s8, 3 }
  0x14   : > { %s1198_s9 = smov (%p41_p5, %s39_s9), 0 }
  0x15   : > { %p294_p8 = pnand %p826_p6, %p293_p7 }
  0x16   : > { %p346_p9 = scmp.lt.s32.totalorder (!%p294_p8), %s1025_s29, 1  ;;  %s358_s10 = sld [smem:[#allocation4 + %s1025_s29]] (!%p294_p8) }
  0x17   : > { %297 = sbr.rel (%p294_p8) target bundleno = 541 (0x21d), region = 44  ;;  %p383_p10 = scmp.eq.s32.totalorder (!%p294_p8), %s1025_s29, 0 }
  0x1c   : > { %p360_p11 = scmp.lt.s32.totalorder (!%p294_p8), %s358_s10, 1 }
  0x1e   : > { %s347_s11 = scalar_select %p346_p9, %s1025_s29, 1 }
  0x1f   : > { %s1200_s10 = smov (!%p360_p11, %s358_s10), 1  ;;  %388 = sbr.rel (!%p383_p10) target bundleno = 38 (0x26), region = 48 }
  0x20   : > { %s853_s12 = sshll.u32 %s347_s11, 3  ;;  %s855_s13 = sshll.u32 %s347_s11, 4  ;;  %v1036_v0 = vmov (%p383_p10), 0.0  }
  0x21   : > { %s1113_s16 = scalar_lea.vmem %s1187_s1, %s853_s12  ;;  %s374_s19 = scalar_lea.vmem %s1189_s3, %s855_s13  ;;  %389 = vst [vmem:[#allocation2] sm:$0xff] (%p383_p10), %v1036_v0  ;;  %390 = vst [vmem:[#allocation2 + $0x8] sm:$0xff] (%p383_p10), %v1036_v0 }
  0x22   : > { %s854_s20 = sshll.u32 %s1200_s10, 6 }
  0x23   : > { %s1121_s23 = scalar_lea.vmem %s1188_s2, %s854_s20 }
  0x26 PF: > { %v958_v1 = vld [vmem:[%s1121_s23] sm:$0xff]   ;;  %v1037_v2 = vmov 0.0   ;;  %v959_v3 = vld [vmem:[%s1121_s23 + $0x8] sm:$0xff]   ;;  %vm1038_vm0 = vmmov 0   ;;  %v960_v4 = vld [vmem:[%s1121_s23 + $0x10] sm:$0xff]   ;;  %vm508_vm1 = vcmask 130048  }
  0x27   : > { %879 = vmatprep.subr.bf16.mxu0 %v1037_v2  ;;  %895 = vmatprep.mubr.msk.bf16.mxu0 %vm1038_vm0, %v1037_v2  ;;  %v506_v5 = vld [vmem:[%s374_s19] sm:$0xff]  ;;  %v507_v6 = vld [vmem:[%s374_s19 + $0x8] sm:$0xff]  ;;  %v961_v7 = vld [vmem:[%s1121_s23 + $0x18] sm:$0xff]   ;;  %p594_p12 = scmp.eq.s32.totalorder %s1025_s29, 1 }
  0x28   : > { %880 = vmatpush3.bf16.msra.mxu0 %v958_v1  ;;  %v913_v8 = vpack.c.bf16 %v507_v6, %v506_v5  ;;  %v962_v9 = vld [vmem:[%s1121_s23 + $0x20] sm:$0xff]   ;;  %v963_v10 = vld [vmem:[%s1121_s23 + $0x28] sm:$0xff]   ;;  %v964_v11 = vld [vmem:[%s1121_s23 + $0x30] sm:$0xff]  }
  0x29   : > { %881 = vmatprep.subr.bf16.mxu0 %v1037_v2  ;;  %v965_v12 = vld [vmem:[%s1121_s23 + $0x38] sm:$0xff]   ;;  %v966_v13 = vld [vmem:[%s1113_s16] sm:$0xff]   ;;  %v505_v18 = vld [vmem:[#allocation2 + $0x8] sm:$0xff] }
  0x2a   : > { %914 = vmatprep.subr.bf16.mxu1 %v913_v8  ;;  %v504_v19 = vld [vmem:[#allocation2] sm:$0xff]  ;;  %v606_v25 = vld [vmem:[%s1191_s5 + $0x8] sm:$0xff] (%p594_p12) }
  0x2b   : > { %916 = vmatpush3.bf16.msra.mxu1 %v913_v8  ;;  %v605_v24 = vld [vmem:[%s1191_s5] sm:$0xff] (%p594_p12) }
  0x2c   : > { %882 = vmatpush3.bf16.msra.mxu0 %v959_v3  ;;  %v859_v26 = vld [vmem:[%s1190_s4] sm:$0xff] (%p594_p12)   ;;  %v917_v27 = vpack.c.bf16 (%p594_p12), %v606_v25, %v605_v24 }
  0x2d   : > { %883 = vmatprep.subr.bf16.mxu0 %v1037_v2  ;;  %v860_v28 = vunpack.c.l.bf16 (%p594_p12), %v859_v26  ;;  %v861_v29 = vunpack.c.h.bf16 (%p594_p12), %v859_v26  ;;  %v848_v33 = vld [vmem:[%s1192_s6] ss:$0 sm:$0xff] (%p594_p12) }
  0x30   : > { %884 = vmatpush3.bf16.msra.mxu0 %v960_v4 }
  0x31   : > { %885 = vmatprep.subr.bf16.mxu0 %v1037_v2 }
  0x34   : > { %886 = vmatpush3.bf16.msra.mxu0 %v961_v7 }
  0x35   : > { %887 = vmatprep.subr.bf16.mxu0 %v1037_v2 }
  0x38   : > { %888 = vmatpush3.bf16.msra.mxu0 %v962_v9 }
  0x39   : > { %889 = vmatprep.subr.bf16.mxu0 %v1037_v2 }
  0x3c   : > { %890 = vmatpush3.bf16.msra.mxu0 %v963_v10 }
  0x3d   : > { %891 = vmatprep.subr.bf16.mxu0 %v1037_v2 }
  0x40   : > { %892 = vmatpush3.bf16.msra.mxu0 %v964_v11 }
  0x41   : > { %893 = vmatprep.subr.bf16.mxu0 %v1037_v2 }
  0x44   : > { %894 = vmatpush3.bf16.msra.mxu0 %v965_v12 }
  0x45   : > { %918 = vmatprep.subr.bf16.mxu0 (%p594_p12), %v917_v27 }
  0x47   : > { %896 = vmatmul.mubr.bf16.vlgmr.msra.gmra.mrb[0].mxu0 %v966_v13 }
  0x48   : > { %910 = vmatprep.mubr.msk.f32.mxu0 (%p594_p12), %vm508_vm1, %v860_v28  ;;  %920 = vmatpush3.bf16.msra.mxu0 (%p594_p12), %v917_v27 }
 0x11a   : > { %v497_v14 = vpop.f32.mrb[0].mxu0 }
 0x11b   : > { %v897_v15 = vpop.f32.mrb[1].mxu0  ;;  %903 = vmatprep.mubr.msk.f32.mxu1 %vm508_vm1, %v497_v14  ;;  %911 = vmatmul.mubr.msk.f32.vlgmr.msra.gmra.mrb[0].mxu0 (%p594_p12), %vm508_vm1, %v861_v29 }
 0x11c   : > { %v500_v16 = vpop.f32.mrb[2].mxu0 }
 0x11d   : > { %v898_v17 = vpop.f32.mrb[3].mxu0  ;;  %904 = vmatmul.mubr.msk.f32.vlgmr.msra.gmra.mrb[0].mxu1 %vm508_vm1, %v500_v16 }
 0x1ee   : > { %598 = sbr.rel (!%p594_p12) target bundleno = 515 (0x203), region = 52  ;;  %v912_v32 = vpop.f32.mrb[0].mxu0 (%p594_p12) }
 0x1ef   : > { %v679_v35 = vpop.f32.mrb[1].mxu0 (%p594_p12) }
 0x1f0   : > { %v905_v20 = vpop.f32.mrb[0].mxu1 }
 0x1f1   : > { %v591_v21 = vadd.f32 %v905_v20, %v505_v18  ;;  %v581_v22 = vpop.f32.mrb[1].mxu1 }
 0x1f2   : > { %v590_v23 = vadd.f32 %v581_v22, %v504_v19 }
 0x1f3   : > { %593 = vst [vmem:[#allocation2 + $0x8] sm:$0xff] %v591_v21 }
 0x1f4   : > { %592 = vst [vmem:[#allocation2] sm:$0xff] %v590_v23 }
 0x1fa   : > { %v600_v30 = vld [vmem:[#allocation2 + $0x8] sm:$0xff] }
 0x1fb   : > { %v599_v31 = vld [vmem:[#allocation2] sm:$0xff]  ;;  %v689_v34 = vadd.f32 %v912_v32, %v600_v30 }
 0x1fc   : > { %v688_v36 = vadd.f32 %v679_v35, %v599_v31 }
 0x1fd   : > { %v698_v37 = vadd.f32 %v848_v33, %v689_v34 }
 0x1fe   : > { %v697_v38 = vadd.f32 %v848_v33, %v688_v36 }
 0x1ff   : > { %v700_v39 = vmax.f32 %v698_v37, 0.0 }
 0x200   : > { %v699_v40 = vmax.f32 %v697_v38, 0.0 }
 0x201   : > { %702 = vst [vmem:[#allocation5 + $0x8] sm:$0xff] %v700_v39 }
 0x202   : > { %701 = vst [vmem:[#allocation5] sm:$0xff] %v699_v40 }
 0x203 PF: > { %p1151_p13 = scmp.eq.s32.totalorder %s822_s0, 1  ;;  %s1039_s13 = smov [#allocation5]  }
 0x204   : > { %s712_s14 = sshll.u32 %s1039_s13, 4  ;;  %s713_s14 = int_to_ptr.vmem [resolvable:$true] %s712_s14 }
 0x205   : > { %s979_s15 = scalar_lea.vmem %s713_s14, 256  ;;  %p986_p3 = scmp.lt.s32.totalorder %s713_s14, %s713_s14 }
 0x206   : > { %p980_p0 = scmp.ne.s32.totalorder %s713_s14, %s979_s15  ;;  %p987_p4 = scmp.lt.s32.totalorder %s979_s15, %s979_s15 }
 0x208   : > { %p981_p1 = pnand %p980_p0, %p1151_p13  ;;  %p988_p5 = por %p987_p4, %p986_p3 }
 0x20a   : > { %p982_p2 = pneg %p981_p1 }
 0x20c   : > { %p989_p6 = pnand %p988_p5, %p982_p2 }
 0x20e   : > { %992 = shalt.err (!%p989_p6)
}
 0x20f   : > { %s993_s0 = scalar_lea.hbm %s1193_s7, 256 }
 0x210   : > { %p994_p7 = scmp.ne.s32.totalorder %s1193_s7, %s993_s0  ;;  %p999_p10 = scmp.lt.u32.totalorder %s993_s0, %s1193_s7 }
 0x212   : > { %p995_p8 = pnand %p994_p7, %p1151_p13 }
 0x214   : > { %p996_p9 = pneg %p995_p8 }
 0x216   : > { %p1001_p11 = pnand %p999_p10, %p996_p9 }
 0x218   : > { %1004 = shalt.err (!%p1001_p11)
}
 0x219   : > { %s1040_s22 = smov 128   ;;  %s1041_s23 = smov 8  }
 0x21a   : > { %922 = dma.vmem_to_hbm [thread:$0]  (%p1151_p13), %s713_s14, 256, %s1193_s7, [#allocation6], %s1040_s22, %s1040_s22, %s1041_s23  }
 0x21b   : > { %1020 = dma.done.wait (%p1151_p13), [#allocation6], 256  }
 0x21c   : > { %1022 = vsyncadd (%p1151_p13), [#allocation6], 4294967040 }
 0x21d PF: > { %s24_s8 = sadd.s32 1, %s1033_s8   ;;  %s1195_s29 = smov %s1029_s30 }
 0x21e   : > { %p21_p12 = scmp.ge.s32.totalorder %s24_s8, 4   ;;  %s1196_s30 = smov %s1198_s9 }
 0x220   :  { %23 = sbr.rel (!%p21_p12) target bundleno = 17 (0x11), region = 89 }
 0x227   :  { %728 = vsyncpa [#allocation6], 1 }
 0x228   :  { %730 = vsyncpa [#allocation6 + $0x1], 1 }

</bundles_post_ra>
